<compile_context>
chip_gen: v7x
topology: tpu7x:2x2x1
jax: 0.10.0
libtpu: 0.0.40
codegen_flags: <defaults>
</compile_context>

<pallas_src>
import jax
import jax.numpy as jnp
from jax.experimental import pallas as pl
from jax.experimental.pallas import tpu as pltpu


def _chomp_copy_kernel(x_ref, o_ref):
    # x_ref / o_ref: identical (R_tile, L_tile) VMEM blocks.
    o_ref[...] = x_ref[...]


def _round_up(x: int, m: int) -> int:
    return ((x + m - 1) // m) * m


def chomp1d(x: jax.Array, chomp_size: int, *, r_tile: int = 512,
            l_tile: int = 1024) -> jax.Array:
    """Equivalent of PyTorch Chomp1d.forward: x[:, :, :-chomp_size]."""
    assert chomp_size > 0, "chomp_size must be positive (matches x[:, :, :-k])"
    n, c, l_in = x.shape
    l_out = l_in - chomp_size
    assert l_out > 0, "chomp_size must be smaller than sequence length"

    # Flatten (N, C) into one row axis: free for a contiguous NCL tensor and
    # lets a single tile span many (batch, channel) rows -> dense DMAs even
    # when C is tiny (TCNs commonly have C in the tens).
    rows = n * c
    x2 = x.reshape(rows, l_in)

    # Lane (last-dim) tile: always a multiple of 128 so the (8,128) block
    # constraint holds and stores are lane-dense.
    lt = min(l_tile, _round_up(l_out, 128))
    # Sublane (row) tile: full row dim (always legal) or a multiple of 8.
    rt = rows if rows <= r_tile else r_tile

    grid = (pl.cdiv(rows, rt), pl.cdiv(l_out, lt))

    # Same block shape + same index map for input and output: the chomp is
    # realized purely by the grid never visiting columns >= L_out, so the
    # trailing chomp_size columns of x are never read from HBM.
    idx_map = lambda ri, li: (ri, li)
    block = (rt, lt)

    y2 = pl.pallas_call(
        _chomp_copy_kernel,
        out_shape=jax.ShapeDtypeStruct((rows, l_out), x.dtype),
        grid_spec=pltpu.PrefetchScalarGridSpec(
            num_scalar_prefetch=0,
            grid=grid,
            in_specs=[pl.BlockSpec(block, idx_map)],
            out_specs=pl.BlockSpec(block, idx_map),
        ),
        compiler_params=pltpu.CompilerParams(
            dimension_semantics=("parallel", "parallel"),
        ),
    )(x2)

    return y2.reshape(n, c, l_out)


if __name__ == "__main__":
    # Chomp1d has no parameters; chomp_size is a constructor hyperparameter.
    chomp_size = 3

    key = jax.random.PRNGKey(0)
    k0, k1 = jax.random.split(key)

    # Small NCL input consistent with a TCN conv output: batch=2, channels=4, seq=16.
    x = jax.random.normal(k0, (2, 4, 16), dtype=jnp.float32)
    y = jax.block_until_ready(chomp1d(x, chomp_size))
    ref = x[:, :, :-chomp_size]
    assert y.shape == ref.shape, (y.shape, ref.shape)
    assert y.dtype == ref.dtype
    assert jnp.array_equal(y, ref)

    # Also exercise the tiled path: multiple 128-aligned L tiles + ragged tail,
    # plus a row count that does not divide the row tile.
    x2 = jax.random.normal(k1, (3, 5, 1100), dtype=jnp.float32)
    y2 = jax.block_until_ready(chomp1d(x2, 7))
    ref2 = x2[:, :, :-7]
    assert y2.shape == ref2.shape, (y2.shape, ref2.shape)
    assert jnp.array_equal(y2, ref2)

    print("KERNEL_OK")
</pallas_src>

<mosaic_0001>
module attributes {stable_mosaic.version = 11 : i64} {
  func.func @_chomp_copy_kernel(%arg0: i32, %arg1: i32, %arg2: memref<8x128xf32, #tpu.memory_space<vmem>>, %arg3: memref<8x128xf32, #tpu.memory_space<vmem>>) attributes {dimension_semantics = [#tpu.dimension_semantics<parallel>, #tpu.dimension_semantics<parallel>], iteration_bounds = array<i64: 1, 1>, scalar_prefetch = 0 : i64, scratch_operands = 0 : i64, tpu.core_type = #tpu.core_type<tc>, window_params = [{transform_indices = @transform_0, window_bounds = array<i64: 8, 128>}, {transform_indices = @transform_1, window_bounds = array<i64: 8, 128>}]} {
    %c0 = arith.constant 0 : index
    %c0_0 = arith.constant 0 : index
    %0 = vector.load %arg2[%c0, %c0_0] : memref<8x128xf32, #tpu.memory_space<vmem>>, vector<8x128xf32>
    %c0_1 = arith.constant 0 : index
    %c0_2 = arith.constant 0 : index
    %1 = vector.load %arg3[%c0_1, %c0_2] : memref<8x128xf32, #tpu.memory_space<vmem>>, vector<8x128xf32>
    tpu.vector_store %arg3[%c0_1, %c0_2], %0 {strides = array<i32>} : memref<8x128xf32, #tpu.memory_space<vmem>>, vector<8x128xf32>,
    return
  }
  func.func @transform_0(%arg0: i32, %arg1: i32) -> (i32, i32) {
    %c0_i32 = arith.constant 0 : i32
    return %arg0, %arg1 : i32, i32
  }
  func.func @transform_1(%arg0: i32, %arg1: i32) -> (i32, i32) {
    %c0_i32 = arith.constant 0 : i32
    return %arg0, %arg1 : i32, i32
  }
}

</mosaic_0001>

<bundles_post_ra>
// kernel: tpu_custom_call.1
= control target key start
LH: loop header
LB: loop body
LE: loop exit
PB: predicated region body
PF: predicated region fallthrough
CT: control target
= control target key end

     0   :  { %6 = vsyncpa [#allocation3], 0  ;;  %s124_s0 = inlined_call_operand.hbm [shape: f32[8,16], index: 0, kind: input, shape index: {}]   ;;  %s125_s1 = inlined_call_operand.hbm [shape: f32[8,13], index: 1, kind: output, shape index: {}]  }
   0x1   :  { %7 = vsyncpa [#allocation4], 0  ;;  %s88_s6 = smov [#allocation2]   ;;  %s40_s10 = scalar_lea.hbm %s124_s0, 128 }
   0x2   :  { %s14_s7 = sshll.u32 %s88_s6, 4  ;;  %p41_p0 = scmp.ne.s32.totalorder %s124_s0, %s40_s10  ;;  %s15_s7 = int_to_ptr.vmem [resolvable:$true] %s14_s7 }
   0x3   :  { %p44_p1 = scmp.lt.u32.totalorder %s40_s10, %s124_s0 }
   0x5   :  { %p46_p2 = pnand %p44_p1, %p41_p0 }
   0x7   :  { %49 = shalt.err (!%p46_p2)
}
   0x8   :  { %s50_s15 = scalar_lea.vmem %s15_s7, 128  ;;  %p55_p4 = scmp.lt.s32.totalorder %s15_s7, %s15_s7 }
   0x9   :  { %p51_p3 = scmp.ne.s32.totalorder %s15_s7, %s50_s15  ;;  %p56_p5 = scmp.lt.s32.totalorder %s50_s15, %s50_s15 }
   0xb   :  { %p57_p6 = por %p56_p5, %p55_p4 }
   0xd   :  { %p58_p7 = pnand %p57_p6, %p51_p3 }
   0xf   :  { %61 = shalt.err (!%p58_p7)
}
  0x10   :  { %17 = dma.hbm_to_vmem [thread:$0]  %s124_s0, 128, %s15_s7, [#allocation3]  }
  0x11   :  { %84 = dma.done.wait [#allocation3], 128  }
  0x12   :  { %85 = vsyncadd [#allocation3], 4294967168  ;;  %s89_s18 = smov [#allocation5]   ;;  %v21_v0 = vld [vmem:[#allocation2] sm:$0xff] }
  0x13   :  { %s29_s19 = sshll.u32 %s89_s18, 4  ;;  %22 = vst [vmem:[#allocation5] sm:$0xff] %v21_v0  ;;  %s30_s19 = int_to_ptr.vmem [resolvable:$true] %s29_s19 }
  0x14   :  { %s62_s20 = scalar_lea.vmem %s30_s19, 128  ;;  %p67_p9 = scmp.lt.s32.totalorder %s30_s19, %s30_s19 }
  0x15   :  { %p63_p8 = scmp.ne.s32.totalorder %s30_s19, %s62_s20  ;;  %p68_p10 = scmp.lt.s32.totalorder %s62_s20, %s62_s20 }
  0x17   :  { %p69_p11 = por %p68_p10, %p67_p9 }
  0x19   :  { %p70_p12 = pnand %p69_p11, %p63_p8 }
  0x1b   :  { %73 = shalt.err (!%p70_p12)
}
  0x1c   :  { %s74_s23 = scalar_lea.hbm %s125_s1, 128 }
  0x1d   :  { %p75_p13 = scmp.ne.s32.totalorder %s125_s1, %s74_s23  ;;  %p78_p0 = scmp.lt.u32.totalorder %s74_s23, %s125_s1 }
  0x1f   :  { %p80_p1 = pnand %p78_p0, %p75_p13 }
  0x21   :  { %83 = shalt.err (!%p80_p1)
}
  0x22   :  { %32 = dma.vmem_to_hbm [thread:$0]  %s30_s19, 128, %s125_s1, [#allocation4]  }
  0x23   :  { %86 = dma.done.wait [#allocation4], 128  }
  0x24   :  { %87 = vsyncadd [#allocation4], 4294967168 }
  0x25   :  { %36 = vsyncpa [#allocation3], 1 }
  0x26   :  { %37 = vsyncpa [#allocation4], 1 }

</bundles_post_ra>
